<compile_context>
chip_gen: v5e
topology: v5e:2x2
jax: 0.10.0
libtpu: 0.0.40
codegen_flags: <defaults>
</compile_context>

<pallas_src>
import functools

import jax
import jax.numpy as jnp
from jax.experimental import pallas as pl
from jax.experimental.pallas import tpu as pltpu


def _layernorm_kernel(x_ref, g_ref, b_ref, o_ref, *, eps, feat):
    x = x_ref[...].astype(jnp.float32)                   # (tile_r, F)
    mean = jnp.mean(x, axis=-1, keepdims=True)           # (tile_r, 1)
    diff = x - mean
    # torch.std default is the UNBIASED estimator (divide by F - 1) — this is
    # intentional and differs from "standard" (biased) LayerNorm.
    var = jnp.sum(diff * diff, axis=-1, keepdims=True) * (1.0 / (feat - 1))
    std = jnp.sqrt(var)
    # One reciprocal per row on the EUP path instead of tile_r*F divides.
    # approx=False keeps exact semantics within the 1e-5 tolerance.
    inv = pl.reciprocal(std + eps, approx=False)         # (tile_r, 1)
    gamma = g_ref[...].astype(jnp.float32)               # (1, F)
    beta = b_ref[...].astype(jnp.float32)                # (1, F)
    o_ref[...] = ((diff * inv) * gamma + beta).astype(o_ref.dtype)


def _sublane_multiple(dtype):
    itemsize = jnp.dtype(dtype).itemsize
    # second-to-last block dim must match sublane packing: 8/f32, 16/bf16, 32/int8
    return {4: 8, 2: 16, 1: 32}.get(itemsize, 8)


def _choose_tile_rows(rows, feat, dtype,
                      target_block_bytes=2 << 20,
                      max_tile_rows=2048,
                      min_grid_steps=8):
    """Pick a VMEM-sized, sublane-aligned row tile for (rows, feat) blocks."""
    itemsize = jnp.dtype(dtype).itemsize
    sublane = _sublane_multiple(dtype)
    row_bytes = max(1, feat * itemsize)
    tile_r = target_block_bytes // row_bytes
    tile_r = max(sublane, (tile_r // sublane) * sublane)
    tile_r = min(tile_r, max_tile_rows)
    rows_aligned = ((rows + sublane - 1) // sublane) * sublane
    tile_r = min(tile_r, max(sublane, rows_aligned))
    # Keep enough grid steps to feed both TensorCores (megacore) and the
    # double-buffered pipeline; don't let one huge tile collapse the grid.
    while tile_r > sublane and pl.cdiv(rows, tile_r) < min_grid_steps:
        tile_r = max(sublane, ((tile_r // 2) // sublane) * sublane)
    return tile_r


def layer_norm(x, a_2, b_2, eps=1e-6, tile_rows=None):
    """LayerNorm over the last dim. x: (..., F); a_2, b_2: (F,)."""
    orig_shape = x.shape
    feat = orig_shape[-1]
    x2d = x.reshape(-1, feat)                 # cheap reshape, no padding copies
    rows = x2d.shape[0]
    itemsize = jnp.dtype(x.dtype).itemsize

    if tile_rows is None:
        tile_r = _choose_tile_rows(rows, feat, x.dtype)
    else:
        sublane = _sublane_multiple(x.dtype)
        tile_r = max(sublane, (int(tile_rows) // sublane) * sublane)

    grid = (pl.cdiv(rows, tile_r),)           # ragged tail -> masked writeback

    gamma = a_2.reshape(1, feat)
    beta = b_2.reshape(1, feat)

    # VMEM budget: double-buffered input + output blocks plus the params, with
    # headroom. Capped at 48 MiB so it also fits v7x's 64 MiB physical VMEM;
    # floor of 32 MiB raises the v5e/v6e scoped defaults for large tiles.
    block_bytes = tile_r * feat * itemsize
    param_bytes = 2 * feat * jnp.dtype(gamma.dtype).itemsize
    needed = 2 * 2 * block_bytes + 2 * param_bytes
    vmem_limit = int(min(max(2 * needed + (4 << 20), 32 << 20), 48 << 20))

    cost = pl.CostEstimate(
        flops=int(8 * rows * feat),
        transcendentals=int(2 * rows),            # sqrt + reciprocal per row
        bytes_accessed=int(2 * rows * feat * itemsize + param_bytes),
    )

    kernel = functools.partial(_layernorm_kernel, eps=float(eps), feat=feat)

    out = pl.pallas_call(
        kernel,
        out_shape=jax.ShapeDtypeStruct((rows, feat), x.dtype),
        grid_spec=pltpu.PrefetchScalarGridSpec(
            num_scalar_prefetch=0,
            grid=grid,
            in_specs=[
                pl.BlockSpec((tile_r, feat), lambda i: (i, 0)),
                pl.BlockSpec((1, feat), lambda i: (0, 0)),
                pl.BlockSpec((1, feat), lambda i: (0, 0)),
            ],
            out_specs=pl.BlockSpec((tile_r, feat), lambda i: (i, 0)),
        ),
        compiler_params=pltpu.CompilerParams(
            dimension_semantics=("parallel",),
            vmem_limit_bytes=vmem_limit,
        ),
        cost_estimate=cost,
    )(x2d, gamma, beta)

    return out.reshape(orig_shape)


def _reference(x, g, b, eps):
    mean = jnp.mean(x, axis=-1, keepdims=True)
    std = jnp.sqrt(
        jnp.sum((x - mean) ** 2, axis=-1, keepdims=True) / (x.shape[-1] - 1)
    )
    return g * (x - mean) / (std + eps) + b


if __name__ == "__main__":
    key = jax.random.PRNGKey(0)

    # Lane-dense feature dim (multiple of 128) keeps output stores unmasked.
    batch, seq, features = 2, 8, 128
    x = jax.random.normal(key, (batch, seq, features), dtype=jnp.float32)

    # Deterministic parameter init, matching the module's __init__.
    a_2 = jnp.ones((features,), dtype=jnp.float32)
    b_2 = jnp.zeros((features,), dtype=jnp.float32)
    eps = 1e-6

    out = jax.block_until_ready(layer_norm(x, a_2, b_2, eps=eps))
    assert out.shape == x.shape and out.dtype == x.dtype
    assert jnp.allclose(out, _reference(x, a_2, b_2, eps), atol=1e-5, rtol=1e-5)

    # Ragged-row case (rows not a multiple of the tile) with non-trivial affine
    # params: exercised via the cdiv grid + masked tail writeback — no
    # host-side pad/slice copies of the (memory-bound) tensor.
    k1, k2, k3 = jax.random.split(jax.random.PRNGKey(1), 3)
    x2 = jax.random.normal(k1, (2, 10, features), dtype=jnp.float32)  # 20 rows
    g2 = jax.random.normal(k2, (features,), dtype=jnp.float32)
    b2 = jax.random.normal(k3, (features,), dtype=jnp.float32)
    out2 = jax.block_until_ready(layer_norm(x2, g2, b2, eps=eps))
    assert out2.shape == x2.shape and out2.dtype == x2.dtype
    assert jnp.allclose(out2, _reference(x2, g2, b2, eps), atol=1e-5, rtol=1e-5)

    print("KERNEL_OK")
</pallas_src>

<mosaic_0001>
module attributes {stable_mosaic.version = 11 : i64} {
  func.func @_layernorm_kernel(%arg0: i32, %arg1: memref<8x128xf32, #tpu.memory_space<vmem>>, %arg2: memref<1x128xf32, #tpu.memory_space<vmem>>, %arg3: memref<1x128xf32, #tpu.memory_space<vmem>>, %arg4: memref<8x128xf32, #tpu.memory_space<vmem>>) attributes {dimension_semantics = [#tpu.dimension_semantics<parallel>], iteration_bounds = array<i64: 2>, scalar_prefetch = 0 : i64, scratch_operands = 0 : i64, tpu.core_type = #tpu.core_type<tc>, window_params = [{transform_indices = @transform_0, window_bounds = array<i64: 8, 128>}, {pipeline_mode = #tpu.pipeline_mode<synchronous>, transform_indices = @transform_1, window_bounds = array<i64: 1, 128>}, {pipeline_mode = #tpu.pipeline_mode<synchronous>, transform_indices = @transform_2, window_bounds = array<i64: 1, 128>}, {transform_indices = @transform_3, window_bounds = array<i64: 8, 128>}]} {
    %c0 = arith.constant 0 : index
    %c0_0 = arith.constant 0 : index
    %0 = vector.load %arg1[%c0, %c0_0] : memref<8x128xf32, #tpu.memory_space<vmem>>, vector<8x128xf32>
    %cst = arith.constant dense<0.000000e+00> : vector<8xf32>
    %1 = vector.multi_reduction <add>, %0, %cst [1] : vector<8x128xf32> to vector<8xf32>
    %2 = vector.shape_cast %1 : vector<8xf32> to vector<8x1xf32>
    %cst_1 = arith.constant 1.280000e+02 : f32
    %3 = vector.broadcast %cst_1 : f32 to vector<8x1xf32>
    %4 = arith.divf %2, %3 : vector<8x1xf32>
    %5 = vector.broadcast %4 : vector<8x1xf32> to vector<8x128xf32>
    %6 = arith.subf %0, %5 : vector<8x128xf32>
    %7 = arith.mulf %6, %6 : vector<8x128xf32>
    %cst_2 = arith.constant dense<0.000000e+00> : vector<8xf32>
    %8 = vector.multi_reduction <add>, %7, %cst_2 [1] : vector<8x128xf32> to vector<8xf32>
    %9 = vector.shape_cast %8 : vector<8xf32> to vector<8x1xf32>
    %cst_3 = arith.constant 0.00787401571 : f32
    %10 = vector.broadcast %cst_3 : f32 to vector<8x1xf32>
    %11 = arith.mulf %9, %10 : vector<8x1xf32>
    %12 = math.sqrt %11 : vector<8x1xf32>
    %cst_4 = arith.constant 9.99999997E-7 : f32
    %13 = vector.broadcast %cst_4 : f32 to vector<8x1xf32>
    %14 = arith.addf %12, %13 : vector<8x1xf32>
    %15 = tpu.reciprocal %14 : vector<8x1xf32> -> vector<8x1xf32>
    %c0_5 = arith.constant 0 : index
    %c0_6 = arith.constant 0 : index
    %16 = vector.load %arg2[%c0_5, %c0_6] : memref<1x128xf32, #tpu.memory_space<vmem>>, vector<1x128xf32>
    %c0_7 = arith.constant 0 : index
    %c0_8 = arith.constant 0 : index
    %17 = vector.load %arg3[%c0_7, %c0_8] : memref<1x128xf32, #tpu.memory_space<vmem>>, vector<1x128xf32>
    %18 = vector.broadcast %15 : vector<8x1xf32> to vector<8x128xf32>
    %19 = arith.mulf %6, %18 : vector<8x128xf32>
    %20 = vector.broadcast %16 : vector<1x128xf32> to vector<8x128xf32>
    %21 = arith.mulf %19, %20 : vector<8x128xf32>
    %22 = vector.broadcast %17 : vector<1x128xf32> to vector<8x128xf32>
    %23 = arith.addf %21, %22 : vector<8x128xf32>
    %c0_9 = arith.constant 0 : index
    %c0_10 = arith.constant 0 : index
    %24 = vector.load %arg4[%c0_9, %c0_10] : memref<8x128xf32, #tpu.memory_space<vmem>>, vector<8x128xf32>
    tpu.vector_store %arg4[%c0_9, %c0_10], %23 {strides = array<i32>} : memref<8x128xf32, #tpu.memory_space<vmem>>, vector<8x128xf32>,
    return
  }
  func.func @transform_0(%arg0: i32) -> (i32, i32) {
    %c0_i32 = arith.constant 0 : i32
    %c0_i32_0 = arith.constant 0 : i32
    return %arg0, %c0_i32 : i32, i32
  }
  func.func @transform_1(%arg0: i32) -> (i32, i32) {
    %c0_i32 = arith.constant 0 : i32
    %c0_i32_0 = arith.constant 0 : i32
    %c0_i32_1 = arith.constant 0 : i32
    return %c0_i32, %c0_i32_0 : i32, i32
  }
  func.func @transform_2(%arg0: i32) -> (i32, i32) {
    %c0_i32 = arith.constant 0 : i32
    %c0_i32_0 = arith.constant 0 : i32
    %c0_i32_1 = arith.constant 0 : i32
    return %c0_i32, %c0_i32_0 : i32, i32
  }
  func.func @transform_3(%arg0: i32) -> (i32, i32) {
    %c0_i32 = arith.constant 0 : i32
    %c0_i32_0 = arith.constant 0 : i32
    return %arg0, %c0_i32 : i32, i32
  }
}

</mosaic_0001>

<bundles_post_ra>
// kernel: tpu_custom_call.1
= control target key start
LH: loop header
LB: loop body
LE: loop exit
PB: predicated region body
PF: predicated region fallthrough
CT: control target
= control target key end

     0   :  { %8 = vsyncpa [#allocation3], 0  ;;  %s733_s0 = inlined_call_operand.hbm [shape: f32[16,128], index: 0, kind: input, shape index: {}]   ;;  %s734_s1 = inlined_call_operand.hbm [shape: f32[1,128], index: 1, kind: input, shape index: {}]   ;;  %s735_s2 = inlined_call_operand.vmem [shape: f32[1,128], index: 2, kind: input, shape index: {}]   ;;  %s736_s3 = inlined_call_operand.hbm [shape: f32[16,128], index: 3, kind: output, shape index: {}]  }
   0x1   :  { %10 = vsyncpa [#allocation3 + $0x1], 0 }
   0x2   :  { %11 = vsyncpa [#allocation6], 0 }
   0x3   :  { %12 = vsyncpa [#allocation4], 0 }
   0x4   :  { %14 = vsyncpa [#allocation4 + $0x1], 0  ;;  %s588_s12 = smov 0   ;;  %s590_s13 = smov 0  }
   0x5   :  { %s592_s14 = smov 0   ;;  %s594_s15 = smov 0  }
   0x6 LB: > { %s609_s16 = sadd.s32 4294967295, %s564_s15   ;;  %s354_s17 = sadd.s32 4294967294, %s564_s15   ;;  %s564_s15 = sphi %s594_s15, %s746_s15   ;;  %s560_s14 = sphi %s592_s14, %s745_s14   ;;  %s556_s13 = sphi %s590_s13, %s744_s13   ;;  %s552_s12 = sphi %s588_s12, %s743_s12  }
   0x7   : > { %p40_p0 = scmp.ne.s32.totalorder %s556_s13, %s552_s12  ;;  %p41_p1 = scmp.eq.s32.totalorder %s609_s16, 0 }
   0x8   : > { %p106_p2 = scmp.eq.s32.totalorder %s609_s16, 1  ;;  %p112_p3 = scmp.eq.s32.totalorder %s354_s17, 1 }
   0x9   : > { %p618_p4 = por %p41_p1, %p40_p0  ;;  %p355_p5 = scmp.ge.s32.totalorder %s564_s15, 1 }
   0xa   : > { %p623_p6 = por %p112_p3, %p40_p0  ;;  %p119_p7 = scmp.lt.s32.totalorder %s564_s15, 3 }
   0xb   : > { %s131_s22 = sshll.u32 %s734_s1, 4  ;;  %s566_s24 = smov [#allocation5]   ;;  %s132_s22 = int_to_ptr.hbm [resolvable:$true] %s131_s22 }
   0xc   : > { %p631_p8 = pnand %p355_p5, %p119_p7  ;;  %s133_s25 = sshll.u32 %s566_s24, 4  ;;  %s134_s25 = int_to_ptr.vmem [resolvable:$true] %s133_s25 }
   0xd   : > { %s641_s26 = sadd.s32 1, %s564_s15   ;;  %s27_s27 = sadd.s32 1, %s560_s14 }
   0xe   : > { %p376_p10 = pneg %p631_p8  ;;  %s24_s28 = ssub.s32 %s564_s15, %s641_s26 }
   0xf   : > { %p25_p12 = scmp.eq.s32.totalorder %s24_s28, 0  ;;  %p34_p13 = scmp.ne.s32.totalorder %s560_s14, %s556_s13 }
  0x10   : > { %p377_p11 = pnand %p376_p10, %p41_p1  ;;  %p35_p0 = scmp.eq.s32.totalorder %s564_s15, 0 }
  0x11   : > { %s650_s29 = scalar_select %p25_p12, %s560_s14, %s27_s27  }
  0x12   : > { %379 = dma.hbm_to_vmem [thread:$0]  (!%p377_p11), %s132_s22, 16, %s134_s25, [#allocation6]  }
  0x13   : > { %p654_p3 = por %p106_p2, %p34_p13  ;;  %p389_p5 = scmp.lt.s32.totalorder %s564_s15, 2 }
  0x14   : > { %s147_s4 = sand.u32 1, %s560_s14   ;;  %s359_s5 = sshll.u32 %s564_s15, 3 }
  0x15   : > { %p36_p7 = por %p35_p0, %p34_p13  ;;  %s358_s6 = sshll.u32 %s147_s4, 3 }
  0x16   : > { %s155_s9 = scalar_lea.hbm %s733_s0, %s359_s5  ;;  %s151_s11 = scalar_lea.vmem [#allocation2], %s358_s6 }
  0x17   : > { %s157_s10 = sshll.u32 %s155_s9, 4  ;;  %s159_s17 = sshll.u32 %s151_s11, 4  ;;  %s158_s10 = int_to_ptr.hbm [resolvable:$true] %s157_s10  ;;  %s160_s17 = int_to_ptr.vmem [resolvable:$true] %s159_s17 }
  0x18   : > { %p664_p10 = pnand %p389_p5, %p36_p7  ;;  %s148_s21 = scalar_lea.sflag [#allocation3], %s147_s4 }
  0x19   : > { %s464_s22 = sshra.s32 %s158_s10, 4  ;;  %s471_s28 = scalar_lea.hbm %s733_s0, 16  ;;  %s465_s22 = int_to_ptr.hbm [resolvable:$true] %s464_s22 }
  0x1a   : > { %s466_s24 = scalar_lea.hbm %s465_s22, 8  ;;  %p468_p11 = pneg %p664_p10 }
  0x1b   : > { %p467_p2 = scmp.ne.s32.totalorder %s465_s22, %s466_s24  ;;  %p472_p0 = scmp.lt.s32.totalorder %s465_s22, %s733_s0 }
  0x1c   : > { %p473_p5 = scmp.lt.s32.totalorder %s471_s28, %s466_s24 }
  0x1d   : > { %p469_p12 = pnand %p468_p11, %p467_p2 }
  0x1e   : > { %p474_p7 = por %p473_p5, %p472_p0 }
  0x1f   : > { %p470_p13 = pneg %p469_p12 }
  0x21   : > { %p475_p9 = pnand %p474_p7, %p470_p13 }
  0x23   : > { %478 = shalt.err (!%p475_p9)
}
  0x24   : > { %383 = dma.hbm_to_vmem [thread:$0]  (!%p664_p10), %s158_s10, 128, %s160_s17, %s148_s21  }
  0x25   : > { %168 = sbr.rel (%p631_p8) target bundleno = 335 (0x14f), region = 32  ;;  %s681_s4 = sand.u32 (!%p631_p8), 1, %s556_s13  }
  0x26   : > { %s361_s7 = sshll.u32 (!%p631_p8), %s681_s4, 3  ;;  %s171_s8 = scalar_lea.sflag (!%p631_p8), [#allocation3], %s681_s4 }
  0x27   : > { %s174_s9 = scalar_lea.vmem (!%p631_p8), [#allocation2], %s361_s7 }
  0x2a   : > { %539 = dma.done.wait (%p618_p4), %s171_s8, 128  }
  0x2b   : > { %541 = vsyncadd (%p618_p4), %s171_s8, 4294967168 }
  0x2c   : > { %543 = dma.done.wait (%p41_p1), [#allocation6], 16  }
  0x2d   : > { %545 = vsyncadd (%p41_p1), [#allocation6], 4294967280  ;;  %v203_v0 = vld [vmem:[%s174_s9] sm:$0xff]  ;;  %v567_v1 = vmov 128.0   ;;  %s365_s18 = sshll.u32 %s609_s16, 3  ;;  %s202_s16 = scalar_lea.vmem [#allocation7], %s361_s7 }
  0x2e   : > { %204 = vadd.xlane.f32.xlu0 %v203_v0  ;;  %428 = vrcp.f32 %v567_v1  ;;  %v426_v34 = vld [vmem:[#allocation5] ss:$0 sm:$0xff]  ;;  %s269_s11 = scalar_lea.hbm %s736_s3, %s365_s18  ;;  %v427_v37 = vld [vmem:[%s735_s2] ss:$0 sm:$0xff]  ;;  %s271_s21 = sshll.u32 %s202_s16, 4  ;;  %s272_s21 = int_to_ptr.vmem [resolvable:$true] %s271_s21 }
  0x2f   : > { %s273_s22 = sshll.u32 %s269_s11, 4  ;;  %s259_s24 = scalar_lea.sflag [#allocation4], %s681_s4  ;;  %s274_s22 = int_to_ptr.hbm [resolvable:$true] %s273_s22 }
  0x30   : > { %s508_s25 = sshra.s32 %s274_s22, 4  ;;  %s514_s6 = scalar_lea.hbm %s736_s3, 16  ;;  %s509_s25 = int_to_ptr.hbm [resolvable:$true] %s508_s25 }
  0x31   : > { %s510_s27 = scalar_lea.hbm %s509_s25, 8  ;;  %p515_p9 = scmp.lt.s32.totalorder %s509_s25, %s736_s3 }
  0x32   : > { %p511_p1 = scmp.ne.s32.totalorder %s509_s25, %s510_s27  ;;  %p516_p10 = scmp.lt.s32.totalorder %s514_s6, %s510_s27 }
  0x34   : > { %v429_v2 = vpop.eup %428  ;;  %p512_p4 = pnand %p511_p1, %p654_p3  ;;  %p517_p2 = por %p516_p10, %p515_p9 }
  0x35   : > { %v207_v3 = vmul.f32 128.0, %v429_v2  ;;  %vm211_vm0 = vweird.f32 %v429_v2 }
  0x36   : > { %p513_p8 = pneg %p512_p4 }
  0x37   : > { %v208_v4 = vsub.f32 1.0, %v207_v3 }
  0x38   : > { %p518_p11 = pnand %p517_p2, %p513_p8 }
  0x39   : > { %v209_v5 = vmul.f32 %v429_v2, %v208_v4 }
  0x3b   : > { %v210_v6 = vadd.f32 %v429_v2, %v209_v5 }
  0x3d   : > { %v212_v7 = vsel %vm211_vm0, %v429_v2, %v210_v6 }
  0xa1   : > { %v205_v8 = vpop.xlane.xlu0 %204 }
  0xa2   : > { %v213_v9 = vmul.f32 %v212_v7, %v205_v8 }
  0xa4   : > { %v214_v10 = vsub.f32 %v203_v0, %v213_v9 }
  0xa6   : > { %v215_v11 = vmul.f32 %v214_v10, %v214_v10 }
  0xa8   : > { %216 = vadd.xlane.f32.xlu0 %v215_v11 }
 0x11b   : > { %v217_v12 = vpop.xlane.xlu0 %216 }
 0x11c   : > { %v218_v13 = vmul.f32 0.007874016, %v217_v12 }
 0x11e   : > { %430 = vrsqrt.f32 %v218_v13  ;;  %vm226_vm1 = vcmp.eq.f32.partialorder %v218_v13, inf  ;;  %v229_v21 = vand.u32 2147483648, %v218_v13  ;;  %vm228_vm2 = vcmp.eq.f32.partialorder %v218_v13, 0.0 }
 0x124   : > { %v431_v14 = vpop.eup %430 }
 0x125   : > { %v220_v15 = vmul.f32 %v431_v14, %v218_v13 }
 0x127   : > { %v221_v16 = vmul.f32 %v431_v14, %v220_v15 }
 0x129   : > { %v222_v17 = vmul.f32 0.5, %v221_v16 }
 0x12b   : > { %v223_v18 = vsub.f32 1.5, %v222_v17 }
 0x12d   : > { %v224_v19 = vmul.f32 %v431_v14, %v223_v18 }
 0x12f   : > { %v225_v20 = vmul.f32 %v224_v19, %v218_v13 }
 0x131   : > { %v227_v22 = vsel %vm226_vm1, %v218_v13, %v225_v20 }
 0x132   : > { %v230_v23 = vsel %vm228_vm2, %v229_v21, %v227_v22 }
 0x133   : > { %v231_v24 = vadd.f32 1e-06, %v230_v23 }
 0x135   : > { %432 = vrcp.f32 %v231_v24  ;;  %v243_v28 = vand.u32 2147483648, %v231_v24  ;;  %v241_v30 = vand.u32 2147483647, %v231_v24  ;;  %vm237_vm4 = vweird.f32 %v231_v24 }
 0x137   : > { %v244_v32 = vor.u32 1.1754944e-38, %v243_v28  ;;  %vm242_vm6 = vcmp.eq.f32.partialorder %v241_v30, 8.507059e+37 }
 0x13b   : > { %v433_v25 = vpop.eup %432 }
 0x13c   : > { %v233_v26 = vmul.f32 %v433_v25, %v231_v24  ;;  %vm238_vm3 = vweird.f32 %v433_v25 }
 0x13d   : > { %vm239_vm5 = vmor %vm237_vm4, %vm238_vm3 }
 0x13e   : > { %v234_v27 = vsub.f32 1.0, %v233_v26 }
 0x140   : > { %v235_v29 = vmul.f32 %v433_v25, %v234_v27 }
 0x142   : > { %v236_v31 = vadd.f32 %v433_v25, %v235_v29 }
 0x144   : > { %v240_v33 = vsel %vm239_vm5, %v433_v25, %v236_v31 }
 0x145   : > { %v245_v35 = vsel %vm242_vm6, %v244_v32, %v240_v33 }
 0x146   : > { %v248_v36 = vmul.f32 %v245_v35, %v214_v10 }
 0x148   : > { %v252_v38 = vmul.f32 %v426_v34, %v248_v36 }
 0x14a   : > { %v256_v39 = vadd.f32 %v427_v37, %v252_v38 }
 0x14c   : > { %257 = vst [vmem:[%s202_s16] sm:$0xff] %v256_v39 }
 0x14d   : > { %521 = shalt.err (!%p518_p11)
}
 0x14e   : > { %374 = dma.vmem_to_hbm [thread:$0]  (%p654_p3), %s272_s21, 128, %s274_s22, %s259_s24  }
 0x14f PF: > { %s285_s4 = sand.u32 1, %s552_s12   ;;  %p742_p12 = scmp.ge.s32.totalorder %s564_s15, 2 }
 0x150   : > { %s286_s9 = scalar_lea.sflag [#allocation4], %s285_s4 }
 0x151   : > { %p385_p13 = pnand %p742_p12, %p623_p6 }
 0x153   : > { %p386_p0 = pneg %p385_p13 }
 0x155   : > { %547 = dma.done.wait (%p386_p0), %s286_s9, 128  }
 0x156   : > { %549 = vsyncadd (%p386_p0), %s286_s9, 4294967168  ;;  %p17_p5 = scmp.ge.s32.totalorder %s641_s26, 4   ;;  %s743_s12 = smov %s556_s13 }
 0x157   : > { %s744_s13 = smov %s560_s14  ;;  %s745_s14 = smov %s650_s29 }
 0x158   : > { %s746_s15 = smov %s641_s26  ;;  %19 = sbr.rel (!%p17_p5) target bundleno = 6 (0x6), region = 81 }
 0x15d   :  { %292 = vsyncpa [#allocation3], 1 }
 0x15e   :  { %294 = vsyncpa [#allocation3 + $0x1], 1 }
 0x15f   :  { %295 = vsyncpa [#allocation6], 1 }
 0x160   :  { %296 = vsyncpa [#allocation4], 1 }
 0x161   :  { %298 = vsyncpa [#allocation4 + $0x1], 1 }

</bundles_post_ra>
